<compile_context>
chip_gen: v7x
topology: tpu7x:2x2x1
jax: 0.10.0
libtpu: 0.0.40
codegen_flags: <defaults>
</compile_context>

<pallas_src>
import functools

import jax
import jax.numpy as jnp
import numpy as np
from jax.experimental import pallas as pl
from jax.experimental.pallas import tpu as pltpu


def _round_up(n, m):
    return ((n + m - 1) // m) * m


def _cdiv(a, b):
    return -(-a // b)


def tcrnet_kernel(xin_ref, ra_ref, wc_ref, bc_ref, w1p_ref, w2p_ref, bp_ref,
                  wf_ref, bf_ref, out_ref, *, half):
    # Conv1d(k=3, pad=1) + bias + ReLU as one banded matmul: (tb,80)@(80,256).
    y = jnp.maximum(
        jnp.dot(xin_ref[...], wc_ref[...], preferred_element_type=jnp.float32)
        + bc_ref[...], 0.0)                                    # (tb, 2*half)

    # MaxPool1d(2, 2): even-time conv outputs live in lanes [0, half), odd-time
    # outputs in lanes [half, 2*half) -> a single 128-lane-aligned max.  The
    # result is already the flattened feature vector for fc1.
    flat = jnp.maximum(y[:, :half], y[:, half:])               # (tb, half)

    # fc1 (MXU) fused with fc2 (rank-1 VPU outer product into the upper h2
    # lanes); biases of both live in bp.  ReLU == relu(cat([fc1, fc2])).
    emb = (jnp.dot(flat, w1p_ref[...], preferred_element_type=jnp.float32)
           + ra_ref[...] * w2p_ref[...] + bp_ref[...])         # (tb, 2*h2)
    emb = jnp.maximum(emb, 0.0)

    # Final Linear, lane-padded to 128 output columns (unmasked store).
    out = (jnp.dot(emb, wf_ref[...], preferred_element_type=jnp.float32)
           + bf_ref[...])                                      # (tb, ncls_pad)
    out_ref[...] = out.astype(out_ref.dtype)


def prepare_tcrnet_params(conv_w, conv_b, w1, b1, w2, b2, wf, bf, *, L=16):
    """One-time weight re-layout (keep out of the per-call hot path).

    PyTorch-shaped parameters:
      conv_w (cout, cin, 3), conv_b (cout,), w1 (h2, cout*(L/2)), b1 (h2,),
      w2 (h2, 1), b2 (h2,), wf (ncls, 2*h2), bf (ncls,).
    """
    cout, cin, k = conv_w.shape
    assert k == 3 and L % 2 == 0
    h2 = w1.shape[0]
    ncls = wf.shape[0]
    half = (L // 2) * cout
    assert w1.shape[1] == half and wf.shape[1] == 2 * h2
    ncls_pad = _round_up(max(ncls, 1), 128)

    # Banded / Toeplitz conv weight (L*cin, L*cout).  Rows for out-of-range
    # taps stay zero => conv padding=1 is folded into the weight.  Output
    # columns are ordered even-times-first, column index = parity*half +
    # m*cout + o  (t = 2m + parity).
    taps = [conv_w[:, :, dk].T.astype(jnp.float32) for dk in range(k)]  # (cin,cout)
    w4 = jnp.zeros((L, cin, L, cout), jnp.float32)       # [t_in, c, t_out, o]
    for t in range(L):
        for dk in range(k):
            tp = t + dk - 1
            if 0 <= tp < L:
                w4 = w4.at[tp, :, t, :].set(taps[dk])
    order = jnp.array([2 * m for m in range(L // 2)]
                      + [2 * m + 1 for m in range(L // 2)], jnp.int32)
    wc = w4[:, :, order, :].reshape(L * cin, L * cout)
    bc = jnp.tile(conv_b.astype(jnp.float32), L).reshape(1, L * cout)

    # fc1 weight: permute columns from PyTorch's channel-major flatten order
    # (o*(L/2)+m) to the kernel's pooled-lane order (m*cout+o), transpose to
    # (half, h2), and pad to 2*h2 columns.  fc2 (in_features=1) becomes an
    # outer-product row occupying the upper h2 lanes; both biases share bp.
    w1_t = (w1.reshape(h2, cout, L // 2).transpose(0, 2, 1)
              .reshape(h2, half).T).astype(jnp.float32)          # (half, h2)
    w1p = jnp.zeros((half, 2 * h2), jnp.float32).at[:, :h2].set(w1_t)
    w2p = jnp.zeros((1, 2 * h2), jnp.float32).at[0, h2:].set(
        w2.reshape(h2).astype(jnp.float32))
    bp = jnp.concatenate([b1.astype(jnp.float32),
                          b2.astype(jnp.float32)]).reshape(1, 2 * h2)

    # Final Linear, lane-padded to ncls_pad (=128) output columns.
    wf_pad = jnp.zeros((2 * h2, ncls_pad), jnp.float32).at[:, :ncls].set(
        wf.T.astype(jnp.float32))
    bf_pad = jnp.zeros((1, ncls_pad), jnp.float32).at[0, :ncls].set(
        bf.astype(jnp.float32))

    return dict(wc=wc, bc=bc, w1p=w1p, w2p=w2p, bp=bp, wf=wf_pad, bf=bf_pad,
                L=L, cin=cin, cout=cout, h2=h2, ncls=ncls, half=half,
                ncls_pad=ncls_pad)


def conv1d_tcrnet(x, ra, params, *, batch_tile=512):
    """x: (B, L, cin) f32; ra: (B, 1); params from prepare_tcrnet_params."""
    B, L, cin = x.shape
    assert L == params["L"] and cin == params["cin"]
    half = params["half"]
    ncls, ncls_pad = params["ncls"], params["ncls_pad"]
    h2, cout = params["h2"], params["cout"]

    # Batch tiling: multiples of 8; >=2 grid steps whenever the batch allows
    # it so the "parallel" axis can shard across both v7x TensorCores, and
    # pick tb to minimize padded rows.
    b8 = _round_up(B, 8)
    steps = _cdiv(b8, _round_up(batch_tile, 8))
    if b8 >= 16:
        steps = max(steps, 2)
    tb = _round_up(_cdiv(b8, steps), 8)
    b_pad = tb * steps

    # Lane-dense 2-D input block: plain reshape, no zero-padded HBM copy (the
    # conv padding lives in the Toeplitz weight's zero rows).
    xin = x.astype(jnp.float32).reshape(B, L * cin)
    ra_f = ra.astype(jnp.float32).reshape(B, 1)
    if b_pad != B:
        xin = jnp.pad(xin, ((0, b_pad - B), (0, 0)))
        ra_f = jnp.pad(ra_f, ((0, b_pad - B), (0, 0)))

    kernel = functools.partial(tcrnet_kernel, half=half)

    flops = b_pad * (2 * (L * cin) * (L * cout)      # banded conv matmul
                     + 2 * half * 2 * h2             # fused fc1/fc2 matmul
                     + 2 * h2                        # fc2 outer product
                     + 2 * 2 * h2 * ncls_pad)        # final fc
    bytes_accessed = 4 * (b_pad * (L * cin + 1 + ncls_pad)
                          + params["wc"].size + params["bc"].size
                          + params["w1p"].size + params["w2p"].size
                          + params["bp"].size + params["wf"].size
                          + params["bf"].size)

    out = pl.pallas_call(
        kernel,
        out_shape=jax.ShapeDtypeStruct((b_pad, ncls_pad), jnp.float32),
        grid=(b_pad // tb,),
        in_specs=[
            pl.BlockSpec((tb, L * cin), lambda b: (b, 0)),        # x (flat)
            pl.BlockSpec((tb, 1), lambda b: (b, 0)),              # RA
            pl.BlockSpec(params["wc"].shape, lambda b: (0, 0)),   # Toeplitz W
            pl.BlockSpec(params["bc"].shape, lambda b: (0, 0)),   # conv bias
            pl.BlockSpec(params["w1p"].shape, lambda b: (0, 0)),  # fc1 (padded)
            pl.BlockSpec(params["w2p"].shape, lambda b: (0, 0)),  # fc2 row
            pl.BlockSpec(params["bp"].shape, lambda b: (0, 0)),   # b1|b2
            pl.BlockSpec(params["wf"].shape, lambda b: (0, 0)),   # final W (padded)
            pl.BlockSpec(params["bf"].shape, lambda b: (0, 0)),   # final bias
        ],
        out_specs=pl.BlockSpec((tb, ncls_pad), lambda b: (b, 0)),
        compiler_params=pltpu.CompilerParams(
            dimension_semantics=("parallel",)),
        cost_estimate=pl.CostEstimate(flops=int(flops), transcendentals=0,
                                      bytes_accessed=int(bytes_accessed)),
    )(xin, ra_f, params["wc"], params["bc"], params["w1p"], params["w2p"],
      params["bp"], params["wf"], params["bf"])
    return out[:B, :ncls]


def tcrnet_reference(x, ra, conv_w, conv_b, w1, b1, w2, b2, wf, bf):
    """Pure-JAX transcription of the PyTorch forward, for verification."""
    B, L, cin = x.shape
    cout = conv_w.shape[0]
    xt = jnp.transpose(x, (0, 2, 1))                          # (B, cin, L)
    xpad = jnp.pad(xt, ((0, 0), (0, 0), (1, 1)))
    y = jnp.zeros((B, cout, L), jnp.float32)
    for dk in range(3):
        y = y + jnp.einsum('bcl,oc->bol', xpad[:, :, dk:dk + L], conv_w[:, :, dk])
    y = jnp.maximum(y + conv_b[None, :, None], 0.0)           # relu(conv1(x))
    p = jnp.max(y.reshape(B, cout, L // 2, 2), axis=-1)       # MaxPool1d(2, 2)
    flat = p.reshape(B, cout * (L // 2))                      # x.view(-1, 16*8)
    a = flat @ w1.T + b1
    r = ra @ w2.T + b2
    emb = jnp.maximum(jnp.concatenate([a, r], axis=1), 0.0)
    return emb @ wf.T + bf


if __name__ == "__main__":
    hidden_dim, num_class = 32, 4
    B, L, Cin, Cout = 2, 16, 5, 16
    H2 = hidden_dim // 2

    key = jax.random.PRNGKey(0)
    ks = jax.random.split(key, 10)
    x = jax.random.normal(ks[0], (B, L, Cin), jnp.float32)
    ra = jax.random.normal(ks[1], (B, 1), jnp.float32)
    conv_w = jax.random.normal(ks[2], (Cout, Cin, 3), jnp.float32) / np.sqrt(Cin * 3)
    conv_b = jax.random.normal(ks[3], (Cout,), jnp.float32) * 0.1
    w1 = jax.random.normal(ks[4], (H2, Cout * (L // 2)), jnp.float32) / np.sqrt(Cout * (L // 2))
    b1 = jax.random.normal(ks[5], (H2,), jnp.float32) * 0.1
    w2 = jax.random.normal(ks[6], (H2, 1), jnp.float32)
    b2 = jax.random.normal(ks[7], (H2,), jnp.float32) * 0.1
    wf = jax.random.normal(ks[8], (num_class, hidden_dim), jnp.float32) / np.sqrt(hidden_dim)
    bf = jax.random.normal(ks[9], (num_class,), jnp.float32) * 0.1

    # One-time weight re-layout (out of the hot path).
    params = prepare_tcrnet_params(conv_w, conv_b, w1, b1, w2, b2, wf, bf, L=L)

    out = conv1d_tcrnet(x, ra, params)
    jax.block_until_ready(out)
    ref = tcrnet_reference(x, ra, conv_w, conv_b, w1, b1, w2, b2, wf, bf)
    np.testing.assert_allclose(np.asarray(out), np.asarray(ref),
                               rtol=1e-5, atol=1e-5)

    # Second check: batch large enough to exercise the multi-step (2-core)
    # grid path and batch padding.
    B2 = 24
    kx, kr = jax.random.split(jax.random.PRNGKey(1))
    x2 = jax.random.normal(kx, (B2, L, Cin), jnp.float32)
    ra2 = jax.random.normal(kr, (B2, 1), jnp.float32)
    out2 = conv1d_tcrnet(x2, ra2, params)
    jax.block_until_ready(out2)
    ref2 = tcrnet_reference(x2, ra2, conv_w, conv_b, w1, b1, w2, b2, wf, bf)
    np.testing.assert_allclose(np.asarray(out2), np.asarray(ref2),
                               rtol=1e-5, atol=1e-5)

    print("KERNEL_OK")
</pallas_src>

<mosaic_0001>
module attributes {stable_mosaic.version = 11 : i64} {
  func.func @tcrnet_kernel(%arg0: i32, %arg1: memref<8x80xf32, #tpu.memory_space<vmem>>, %arg2: memref<8x1xf32, #tpu.memory_space<vmem>>, %arg3: memref<80x256xf32, #tpu.memory_space<vmem>>, %arg4: memref<1x256xf32, #tpu.memory_space<vmem>>, %arg5: memref<128x32xf32, #tpu.memory_space<vmem>>, %arg6: memref<1x32xf32, #tpu.memory_space<vmem>>, %arg7: memref<1x32xf32, #tpu.memory_space<vmem>>, %arg8: memref<32x128xf32, #tpu.memory_space<vmem>>, %arg9: memref<1x128xf32, #tpu.memory_space<vmem>>, %arg10: memref<8x128xf32, #tpu.memory_space<vmem>>) attributes {dimension_semantics = [#tpu.dimension_semantics<parallel>], iteration_bounds = array<i64: 1>, scalar_prefetch = 0 : i64, scratch_operands = 0 : i64, tpu.core_type = #tpu.core_type<tc>, window_params = [{transform_indices = @transform_0, window_bounds = array<i64: 8, 80>}, {transform_indices = @transform_1, window_bounds = array<i64: 8, 1>}, {pipeline_mode = #tpu.pipeline_mode<synchronous>, transform_indices = @transform_2, window_bounds = array<i64: 80, 256>}, {pipeline_mode = #tpu.pipeline_mode<synchronous>, transform_indices = @transform_3, window_bounds = array<i64: 1, 256>}, {pipeline_mode = #tpu.pipeline_mode<synchronous>, transform_indices = @transform_4, window_bounds = array<i64: 128, 32>}, {pipeline_mode = #tpu.pipeline_mode<synchronous>, transform_indices = @transform_5, window_bounds = array<i64: 1, 32>}, {pipeline_mode = #tpu.pipeline_mode<synchronous>, transform_indices = @transform_6, window_bounds = array<i64: 1, 32>}, {pipeline_mode = #tpu.pipeline_mode<synchronous>, transform_indices = @transform_7, window_bounds = array<i64: 32, 128>}, {pipeline_mode = #tpu.pipeline_mode<synchronous>, transform_indices = @transform_8, window_bounds = array<i64: 1, 128>}, {transform_indices = @transform_9, window_bounds = array<i64: 8, 128>}]} {
    %c0 = arith.constant 0 : index
    %c0_0 = arith.constant 0 : index
    %0 = vector.load %arg1[%c0, %c0_0] : memref<8x80xf32, #tpu.memory_space<vmem>>, vector<8x80xf32>
    %c0_1 = arith.constant 0 : index
    %c0_2 = arith.constant 0 : index
    %1 = vector.load %arg3[%c0_1, %c0_2] : memref<80x256xf32, #tpu.memory_space<vmem>>, vector<80x256xf32>
    %cst = arith.constant dense<0.000000e+00> : vector<8x256xf32>
    %2 = tpu.matmul %0, %1, %cst {dimension_numbers = #tpu.dot_dimension_numbers<[1], [0], [0], [1], [0, 0, 1, 1], [], []>} : vector<8x80xf32>, vector<80x256xf32>, vector<8x256xf32> -> vector<8x256xf32>
    %c0_3 = arith.constant 0 : index
    %c0_4 = arith.constant 0 : index
    %3 = vector.load %arg4[%c0_3, %c0_4] : memref<1x256xf32, #tpu.memory_space<vmem>>, vector<1x256xf32>
    %4 = vector.broadcast %3 : vector<1x256xf32> to vector<8x256xf32>
    %5 = arith.addf %2, %4 : vector<8x256xf32>
    %cst_5 = arith.constant 0.000000e+00 : f32
    %6 = vector.broadcast %cst_5 : f32 to vector<8x256xf32>
    %7 = arith.maximumf %5, %6 : vector<8x256xf32>
    %8 = vector.extract_strided_slice %7 {offsets = [0, 0], sizes = [8, 128], strides = [1, 1]} : vector<8x256xf32> to vector<8x128xf32>
    %9 = vector.extract_strided_slice %7 {offsets = [0, 128], sizes = [8, 128], strides = [1, 1]} : vector<8x256xf32> to vector<8x128xf32>
    %10 = arith.maximumf %8, %9 : vector<8x128xf32>
    %c0_6 = arith.constant 0 : index
    %c0_7 = arith.constant 0 : index
    %11 = vector.load %arg5[%c0_6, %c0_7] : memref<128x32xf32, #tpu.memory_space<vmem>>, vector<128x32xf32>
    %cst_8 = arith.constant dense<0.000000e+00> : vector<8x32xf32>
    %12 = tpu.matmul %10, %11, %cst_8 {dimension_numbers = #tpu.dot_dimension_numbers<[1], [0], [0], [1], [0, 0, 1, 1], [], []>} : vector<8x128xf32>, vector<128x32xf32>, vector<8x32xf32> -> vector<8x32xf32>
    %c0_9 = arith.constant 0 : index
    %c0_10 = arith.constant 0 : index
    %13 = vector.load %arg2[%c0_9, %c0_10] : memref<8x1xf32, #tpu.memory_space<vmem>>, vector<8x1xf32>
    %c0_11 = arith.constant 0 : index
    %c0_12 = arith.constant 0 : index
    %14 = vector.load %arg6[%c0_11, %c0_12] : memref<1x32xf32, #tpu.memory_space<vmem>>, vector<1x32xf32>
    %15 = vector.broadcast %13 : vector<8x1xf32> to vector<8x32xf32>
    %16 = vector.broadcast %14 : vector<1x32xf32> to vector<8x32xf32>
    %17 = arith.mulf %15, %16 : vector<8x32xf32>
    %18 = arith.addf %12, %17 : vector<8x32xf32>
    %c0_13 = arith.constant 0 : index
    %c0_14 = arith.constant 0 : index
    %19 = vector.load %arg7[%c0_13, %c0_14] : memref<1x32xf32, #tpu.memory_space<vmem>>, vector<1x32xf32>
    %20 = vector.broadcast %19 : vector<1x32xf32> to vector<8x32xf32>
    %21 = arith.addf %18, %20 : vector<8x32xf32>
    %cst_15 = arith.constant 0.000000e+00 : f32
    %22 = vector.broadcast %cst_15 : f32 to vector<8x32xf32>
    %23 = arith.maximumf %21, %22 : vector<8x32xf32>
    %c0_16 = arith.constant 0 : index
    %c0_17 = arith.constant 0 : index
    %24 = vector.load %arg8[%c0_16, %c0_17] : memref<32x128xf32, #tpu.memory_space<vmem>>, vector<32x128xf32>
    %cst_18 = arith.constant dense<0.000000e+00> : vector<8x128xf32>
    %25 = tpu.matmul %23, %24, %cst_18 {dimension_numbers = #tpu.dot_dimension_numbers<[1], [0], [0], [1], [0, 0, 1, 1], [], []>} : vector<8x32xf32>, vector<32x128xf32>, vector<8x128xf32> -> vector<8x128xf32>
    %c0_19 = arith.constant 0 : index
    %c0_20 = arith.constant 0 : index
    %26 = vector.load %arg9[%c0_19, %c0_20] : memref<1x128xf32, #tpu.memory_space<vmem>>, vector<1x128xf32>
    %27 = vector.broadcast %26 : vector<1x128xf32> to vector<8x128xf32>
    %28 = arith.addf %25, %27 : vector<8x128xf32>
    %c0_21 = arith.constant 0 : index
    %c0_22 = arith.constant 0 : index
    %29 = vector.load %arg10[%c0_21, %c0_22] : memref<8x128xf32, #tpu.memory_space<vmem>>, vector<8x128xf32>
    tpu.vector_store %arg10[%c0_21, %c0_22], %28 {strides = array<i32>} : memref<8x128xf32, #tpu.memory_space<vmem>>, vector<8x128xf32>,
    return
  }
  func.func @transform_0(%arg0: i32) -> (i32, i32) {
    %c0_i32 = arith.constant 0 : i32
    %c0_i32_0 = arith.constant 0 : i32
    return %arg0, %c0_i32 : i32, i32
  }
  func.func @transform_1(%arg0: i32) -> (i32, i32) {
    %c0_i32 = arith.constant 0 : i32
    %c0_i32_0 = arith.constant 0 : i32
    return %arg0, %c0_i32 : i32, i32
  }
  func.func @transform_2(%arg0: i32) -> (i32, i32) {
    %c0_i32 = arith.constant 0 : i32
    %c0_i32_0 = arith.constant 0 : i32
    %c0_i32_1 = arith.constant 0 : i32
    return %c0_i32, %c0_i32_0 : i32, i32
  }
  func.func @transform_3(%arg0: i32) -> (i32, i32) {
    %c0_i32 = arith.constant 0 : i32
    %c0_i32_0 = arith.constant 0 : i32
    %c0_i32_1 = arith.constant 0 : i32
    return %c0_i32, %c0_i32_0 : i32, i32
  }
  func.func @transform_4(%arg0: i32) -> (i32, i32) {
    %c0_i32 = arith.constant 0 : i32
    %c0_i32_0 = arith.constant 0 : i32
    %c0_i32_1 = arith.constant 0 : i32
    return %c0_i32, %c0_i32_0 : i32, i32
  }
  func.func @transform_5(%arg0: i32) -> (i32, i32) {
    %c0_i32 = arith.constant 0 : i32
    %c0_i32_0 = arith.constant 0 : i32
    %c0_i32_1 = arith.constant 0 : i32
    return %c0_i32, %c0_i32_0 : i32, i32
  }
  func.func @transform_6(%arg0: i32) -> (i32, i32) {
    %c0_i32 = arith.constant 0 : i32
    %c0_i32_0 = arith.constant 0 : i32
    %c0_i32_1 = arith.constant 0 : i32
    return %c0_i32, %c0_i32_0 : i32, i32
  }
  func.func @transform_7(%arg0: i32) -> (i32, i32) {
    %c0_i32 = arith.constant 0 : i32
    %c0_i32_0 = arith.constant 0 : i32
    %c0_i32_1 = arith.constant 0 : i32
    return %c0_i32, %c0_i32_0 : i32, i32
  }
  func.func @transform_8(%arg0: i32) -> (i32, i32) {
    %c0_i32 = arith.constant 0 : i32
    %c0_i32_0 = arith.constant 0 : i32
    %c0_i32_1 = arith.constant 0 : i32
    return %c0_i32, %c0_i32_0 : i32, i32
  }
  func.func @transform_9(%arg0: i32) -> (i32, i32) {
    %c0_i32 = arith.constant 0 : i32
    %c0_i32_0 = arith.constant 0 : i32
    return %arg0, %c0_i32 : i32, i32
  }
}

</mosaic_0001>

<bundles_post_ra>
// kernel: tpu_custom_call.1
= control target key start
LH: loop header
LB: loop body
LE: loop exit
PB: predicated region body
PF: predicated region fallthrough
CT: control target
= control target key end

     0   :  { %14 = vsyncpa [#allocation3], 0  ;;  %s820_s0 = inlined_call_operand.hbm [shape: f32[8,80], index: 0, kind: input, shape index: {}]   ;;  %s821_s1 = inlined_call_operand.vmem [shape: f32[8,1], index: 1, kind: input, shape index: {}]   ;;  %s822_s2 = inlined_call_operand.vmem [shape: f32[80,256], index: 2, kind: input, shape index: {}]   ;;  %s823_s3 = inlined_call_operand.vmem [shape: f32[1,256], index: 3, kind: input, shape index: {}]   ;;  %s824_s4 = inlined_call_operand.vmem [shape: f32[128,32], index: 4, kind: input, shape index: {}]   ;;  %s825_s5 = inlined_call_operand.vmem [shape: f32[1,32], index: 5, kind: input, shape index: {}]   ;;  %s826_s6 = inlined_call_operand.hbm [shape: f32[1,32], index: 6, kind: input, shape index: {}]   ;;  %s827_s7 = inlined_call_operand.vmem [shape: f32[32,128], index: 7, kind: input, shape index: {}]   ;;  %s828_s8 = inlined_call_operand.vmem [shape: f32[1,128], index: 8, kind: input, shape index: {}]   ;;  %s829_s9 = inlined_call_operand.hbm [shape: f32[8,128], index: 9, kind: output, shape index: {}]  }
   0x1   :  { %15 = vsyncpa [#allocation6], 0 }
   0x2   :  { %16 = vsyncpa [#allocation4], 0  ;;  %s582_s30 = smov [#allocation2]   ;;  %s583_s11 = smov [#allocation5]  }
   0x3   :  { %s23_s10 = sshll.u32 %s582_s30, 4  ;;  %s43_s12 = sshll.u32 %s583_s11, 4  ;;  %s24_s10 = int_to_ptr.vmem [resolvable:$true] %s23_s10  ;;  %s44_s12 = int_to_ptr.vmem [resolvable:$true] %s43_s12 }
   0x4   :  { %s510_s15 = scalar_lea.hbm %s820_s0, 128 }
   0x5   :  { %p511_p0 = scmp.ne.s32.totalorder %s820_s0, %s510_s15  ;;  %p514_p1 = scmp.lt.u32.totalorder %s510_s15, %s820_s0 }
   0x7   :  { %p516_p2 = pnand %p514_p1, %p511_p0 }
   0x9   :  { %519 = shalt.err (!%p516_p2)
}
   0xa   :  { %s520_s20 = scalar_lea.vmem %s24_s10, 128  ;;  %p525_p4 = scmp.lt.s32.totalorder %s24_s10, %s24_s10 }
   0xb   :  { %p521_p3 = scmp.ne.s32.totalorder %s24_s10, %s520_s20  ;;  %p526_p5 = scmp.lt.s32.totalorder %s520_s20, %s520_s20 }
   0xd   :  { %p527_p6 = por %p526_p5, %p525_p4 }
   0xf   :  { %p528_p7 = pnand %p527_p6, %p521_p3 }
  0x11   :  { %531 = shalt.err (!%p528_p7)
}
  0x12   :  { %26 = dma.hbm_to_vmem [thread:$0]  %s820_s0, 128, %s24_s10, [#allocation3]  }
  0x13   :  { %s532_s25 = scalar_lea.hbm %s826_s6, 16 }
  0x14   :  { %p533_p8 = scmp.ne.s32.totalorder %s826_s6, %s532_s25  ;;  %p536_p9 = scmp.lt.u32.totalorder %s532_s25, %s826_s6 }
  0x16   :  { %p538_p10 = pnand %p536_p9, %p533_p8 }
  0x18   :  { %541 = shalt.err (!%p538_p10)
}
  0x19   :  { %s542_s30 = scalar_lea.vmem %s44_s12, 16  ;;  %s546_s11 = scalar_lea.vmem %s44_s12, 32 }
  0x1a   :  { %p543_p11 = scmp.ne.s32.totalorder %s44_s12, %s542_s30  ;;  %p547_p12 = scmp.lt.s32.totalorder %s44_s12, %s44_s12 }
  0x1b   :  { %p548_p13 = scmp.lt.s32.totalorder %s546_s11, %s542_s30 }
  0x1d   :  { %p549_p0 = por %p548_p13, %p547_p12 }
  0x1f   :  { %p550_p1 = pnand %p549_p0, %p543_p11 }
  0x21   :  { %553 = shalt.err (!%p550_p1)
}
  0x22   :  { %46 = dma.hbm_to_vmem [thread:$0]  %s826_s6, 16, %s44_s12, [#allocation6]  }
  0x23   :  { %576 = dma.done.wait [#allocation3], 128  }
  0x24   :  { %577 = vsyncadd [#allocation3], 4294967168 }
  0x25   :  { %578 = dma.done.wait [#allocation6], 16  }
  0x26   :  { %579 = vsyncadd [#allocation6], 4294967280  ;;  %v584_v0 = vmov 0.0   ;;  %v585_v1 = vmov 0.0|0.0   ;;  %v59_v2 = vld [vmem:[%s822_s2 + $0x8] sm:$0xff]  ;;  %v61_v3 = vld [vmem:[%s822_s2 + $0x18] sm:$0xff]  ;;  %v80_v59 = vlaneseq }
  0x27   :  { %158 = vmatprep.mubr.f32.mxu0 %v584_v0  ;;  %472 = vmatprep.subr.bf16.mxu1 %v585_v1  ;;  %v58_v4 = vld [vmem:[%s822_s2] sm:$0xff]  ;;  %v452_v5 = vpack.c.bf16 %v61_v3, %v59_v2  ;;  %v60_v6 = vld [vmem:[%s822_s2 + $0x10] sm:$0xff]  ;;  %v63_v7 = vld [vmem:[%s822_s2 + $0x28] sm:$0xff]  ;;  %vm90_vm0 = vcmask 654336   ;;  %vm586_vm1 = vmmov 0   ;;  %v587_v58 = vmov 0  }
  0x28   :  { %v65_v8 = vld [vmem:[%s822_s2 + $0x38] sm:$0xff]  ;;  %v454_v9 = vpack.c.bf16 %v60_v6, %v58_v4  ;;  %v62_v11 = vld [vmem:[%s822_s2 + $0x20] sm:$0xff]  ;;  %v64_v12 = vld [vmem:[%s822_s2 + $0x30] sm:$0xff]  ;;  %438 = vmatprep.mubr.msk.f32.mxu1 %vm586_vm1, %v584_v0  ;;  %509 = vset.pattern.permute.xlu0 %v587_v58  ;;  %v81_v60 = vshrl.u32 %v80_v59, 7  ;;  %vm288_vm2 = vcmask 261120  }
  0x29   :  { %v456_v10 = vpack.c.bf16 %v65_v8, %v63_v7  ;;  %v67_v13 = vld [vmem:[%s822_s2 + $0x48] sm:$0xff]  ;;  %453 = vmatprep.subr.bf16.mxu0 %v452_v5  ;;  %v69_v14 = vld [vmem:[%s822_s2 + $0x58] sm:$0xff]  ;;  %v458_v15 = vpack.c.bf16 %v64_v12, %v62_v11  ;;  %v66_v17 = vld [vmem:[%s822_s2 + $0x40] sm:$0xff] }
  0x2a   :  { %455 = vmatpush1.bf16.msra.mxu0 %v454_v9  ;;  %v460_v16 = vpack.c.bf16 %v69_v14, %v67_v13  ;;  %v68_v18 = vld [vmem:[%s822_s2 + $0x50] sm:$0xff]  ;;  %v71_v19 = vld [vmem:[%s822_s2 + $0x68] sm:$0xff]  ;;  %v73_v20 = vld [vmem:[%s822_s2 + $0x78] sm:$0xff]  ;;  %v82_v61 = vsub.s32 0, %v81_v60  ;;  %v86_v63 = vsub.s32 1, %v81_v60 }
  0x2b   :  { %457 = vmatprep.subr.bf16.mxu0 %v456_v10  ;;  %v168_v21 = vld [vmem:[%s824_s4] sm:$0xff]  ;;  %v169_v22 = vld [vmem:[%s824_s4 + $0x8] sm:$0xff]  ;;  %v170_v23 = vld [vmem:[%s824_s4 + $0x10] sm:$0xff]  ;;  %v462_v24 = vpack.c.bf16 %v68_v18, %v66_v17  ;;  %v464_v27 = vpack.c.bf16 %v73_v20, %v71_v19 }
  0x2c   :  { %v473_v25 = vpack.c.bf16 %v169_v22, %v168_v21  ;;  %v171_v26 = vld [vmem:[%s824_s4 + $0x18] sm:$0xff]  ;;  %v70_v28 = vld [vmem:[%s822_s2 + $0x60] sm:$0xff]  ;;  %v72_v29 = vld [vmem:[%s822_s2 + $0x70] sm:$0xff] }
  0x2d   :  { %v75_v30 = vld [vmem:[%s822_s2 + $0x88] sm:$0xff]  ;;  %v77_v31 = vld [vmem:[%s822_s2 + $0x98] sm:$0xff]  ;;  %v476_v32 = vpack.c.bf16 %v171_v26, %v170_v23  ;;  %v172_v33 = vld [vmem:[%s824_s4 + $0x20] sm:$0xff]  ;;  %v466_v35 = vpack.c.bf16 %v72_v29, %v70_v28 }
  0x2e   :  { %459 = vmatpush1.bf16.msra.mxu0 %v458_v15  ;;  %474 = vmatpush3.bf16.msra.mxu1 %v473_v25  ;;  %v173_v34 = vld [vmem:[%s824_s4 + $0x28] sm:$0xff]  ;;  %v468_v36 = vpack.c.bf16 %v77_v31, %v75_v30  ;;  %v74_v37 = vld [vmem:[%s822_s2 + $0x80] sm:$0xff]  ;;  %v76_v38 = vld [vmem:[%s822_s2 + $0x90] sm:$0xff] }
  0x2f   :  { %461 = vmatprep.subr.bf16.mxu0 %v460_v16  ;;  %475 = vmatprep.subr.bf16.mxu1 %v585_v1  ;;  %v479_v39 = vpack.c.bf16 %v173_v34, %v172_v33  ;;  %v174_v40 = vld [vmem:[%s824_s4 + $0x30] sm:$0xff]  ;;  %v175_v41 = vld [vmem:[%s824_s4 + $0x38] sm:$0xff]  ;;  %v470_v42 = vpack.c.bf16 %v76_v38, %v74_v37  ;;  %v176_v44 = vld [vmem:[%s824_s4 + $0x40] sm:$0xff] }
  0x30   :  { %v482_v43 = vpack.c.bf16 %v175_v41, %v174_v40  ;;  %v177_v45 = vld [vmem:[%s824_s4 + $0x48] sm:$0xff]  ;;  %v57_v46 = vld [vmem:[#allocation2] sm:$0xff]  ;;  %v178_v48 = vld [vmem:[%s824_s4 + $0x50] sm:$0xff] }
  0x31   :  { %v485_v47 = vpack.c.bf16 %v177_v45, %v176_v44  ;;  %v179_v49 = vld [vmem:[%s824_s4 + $0x58] sm:$0xff]  ;;  %v180_v51 = vld [vmem:[%s824_s4 + $0x60] sm:$0xff]  ;;  %v181_v52 = vld [vmem:[%s824_s4 + $0x68] sm:$0xff] }
  0x32   :  { %463 = vmatpush1.bf16.msra.mxu0 %v462_v24  ;;  %477 = vmatpush3.bf16.msra.mxu1 %v476_v32  ;;  %v488_v50 = vpack.c.bf16 %v179_v49, %v178_v48  ;;  %v491_v53 = vpack.c.bf16 %v181_v52, %v180_v51  ;;  %v182_v54 = vld [vmem:[%s824_s4 + $0x70] sm:$0xff]  ;;  %v183_v55 = vld [vmem:[%s824_s4 + $0x78] sm:$0xff]  ;;  %v184_v57 = vld [vmem:[%s821_s1] sm:$0xff] }
  0x33   :  { %465 = vmatprep.subr.bf16.mxu0 %v464_v27  ;;  %478 = vmatprep.subr.bf16.mxu1 %v585_v1  ;;  %v494_v56 = vpack.c.bf16 %v183_v55, %v182_v54  ;;  %v78_v62 = vld [vmem:[%s823_s3] sm:$0x3]  ;;  %v278_v11 = vld [vmem:[%s827_s7 + $0x8] sm:$0xff]  ;;  %v279_v13 = vld [vmem:[%s827_s7 + $0x10] sm:$0xff] }
  0x34   :  { %188 = vperm.xlu0 %509, %v184_v57   ;;  %v83_v2 = vrot.slane %v78_v62, %v82_v61  ;;  %v87_v3 = vrot.slane %v78_v62, %v86_v63  ;;  %v277_v10 = vld [vmem:[%s827_s7] sm:$0xff]  ;;  %v280_v14 = vld [vmem:[%s827_s7 + $0x18] sm:$0xff]  ;;  %v381_v20 = vld [vmem:[#allocation5] ss:$0 sm:$0xff]  ;;  %s588_s7 = smov [#allocation7]  }
  0x35   :  { %v497_v12 = vpack.c.bf16 %v278_v11, %v277_v10  ;;  %v500_v15 = vpack.c.bf16 %v280_v14, %v279_v13  ;;  %v380_v16 = vld [vmem:[%s825_s5] ss:$0 sm:$0xff]  ;;  %s369_s25 = sshll.u32 %s588_s7, 4  ;;  %s370_s25 = int_to_ptr.vmem [resolvable:$true] %s369_s25 }
  0x36   :  { %467 = vmatpush1.bf16.msra.mxu0 %v466_v35  ;;  %480 = vmatpush3.bf16.msra.mxu1 %v479_v39  ;;  %v382_v24 = vld [vmem:[%s828_s8] ss:$0 sm:$0xff]  ;;  %s554_s5 = scalar_lea.vmem %s370_s25, 128  ;;  %p559_p3 = scmp.lt.s32.totalorder %s370_s25, %s370_s25 }
  0x37   :  { %469 = vmatprep.subr.bf16.mxu0 %v468_v36  ;;  %481 = vmatprep.subr.bf16.mxu1 %v585_v1  ;;  %p555_p2 = scmp.ne.s32.totalorder %s370_s25, %s554_s5  ;;  %p560_p4 = scmp.lt.s32.totalorder %s554_s5, %s554_s5 }
  0x39   :  { %p561_p5 = por %p560_p4, %p559_p3 }
  0x3a   :  { %471 = vmatpush1.bf16.msra.mxu0 %v470_v42  ;;  %483 = vmatpush3.bf16.msra.mxu1 %v482_v43 }
  0x3b   :  { %496 = vmatprep.subr.bf16.mxu0 %v585_v1  ;;  %484 = vmatprep.subr.bf16.mxu1 %v585_v1  ;;  %p562_p6 = pnand %p561_p5, %p555_p2 }
  0x3d   :  { %379 = vmatmul.mubr.msk.f32.vlgmr.msra.gmra.mrb[0].mxu0 %vm90_vm0, %v57_v46 }
  0x3e   :  { %486 = vmatpush3.bf16.msra.mxu1 %v485_v47  ;;  %449 = vmatprep.mubr.msk.f32.mxu0 %vm586_vm1, %v584_v0 }
  0x3f   :  { %487 = vmatprep.subr.bf16.mxu1 %v585_v1  ;;  %498 = vmatpush3.bf16.msra.mxu0 %v497_v12 }
  0x40   :  { %499 = vmatprep.subr.bf16.mxu0 %v585_v1 }
  0x42   :  { %489 = vmatpush3.bf16.msra.mxu1 %v488_v50 }
  0x43   :  { %490 = vmatprep.subr.bf16.mxu1 %v585_v1  ;;  %501 = vmatpush3.bf16.msra.mxu0 %v500_v15 }
  0x46   :  { %492 = vmatpush3.bf16.msra.mxu1 %v491_v53 }
  0x47   :  { %493 = vmatprep.subr.bf16.mxu1 %v585_v1 }
  0x4a   :  { %495 = vmatpush3.bf16.msra.mxu1 %v494_v56 }
  0xb3   :  { %v189_v17 = vpop.permute.xlu0 %188 }
  0xb4   :  { %v197_v18 = vmul.f32 %v380_v16, %v189_v17 }
 0x110   :  { %v160_v4 = vpop.f32.mrb[0].mxu0 }
 0x111   :  { %v161_v5 = vadd.f32 %v160_v4, %v83_v2  ;;  %v162_v0 = vpop.f32.mrb[1].mxu0 }
 0x112   :  { %v163_v6 = vadd.f32 %v162_v0, %v87_v3 }
 0x113   :  { %v165_v7 = vmax.f32 %v161_v5, 0.0 }
 0x114   :  { %v166_v8 = vmax.f32 %v163_v6, 0.0 }
 0x116   :  { %v167_v9 = vmax.f32 %v165_v7, %v166_v8 }
 0x118   :  { %439 = vmatmul.mubr.f32.vlgmr.msra.gmra.mrb[0].mxu1 %v167_v9 }
 0x1eb   :  { %v264_v19 = vpop.f32.mrb[0].mxu1 }
 0x1ec   :  { %v265_v21 = vadd.f32 %v264_v19, %v197_v18  ;;  %v440_v1 = vpop.f32.mrb[1].mxu1 }
 0x1ee   :  { %v275_v22 = vadd.f32 %v381_v20, %v265_v21 }
 0x1f0   :  { %v276_v23 = vmax.f32 %v275_v22, 0.0 }
 0x1f2   :  { %450 = vmatmul.mubr.msk.f32.vlgmr.msra.gmra.mrb[2].mxu0 %vm288_vm2, %v276_v23 }
 0x2c5   :  { %v358_v25 = vpop.f32.mrb[2].mxu0 }
 0x2c6   :  { %v359_v26 = vadd.f32 %v382_v24, %v358_v25  ;;  %v451_v27 = vpop.f32.mrb[3].mxu0 }
 0x2c8   :  { %362 = vst [vmem:[#allocation7] sm:$0xff] %v359_v26 }
 0x2c9   :  { %565 = shalt.err (!%p562_p6)
}
 0x2ca   :  { %s566_s28 = scalar_lea.hbm %s829_s9, 128 }
 0x2cb   :  { %p567_p7 = scmp.ne.s32.totalorder %s829_s9, %s566_s28  ;;  %p570_p8 = scmp.lt.u32.totalorder %s566_s28, %s829_s9 }
 0x2cd   :  { %p572_p9 = pnand %p570_p8, %p567_p7 }
 0x2cf   :  { %575 = shalt.err (!%p572_p9)
}
 0x2d0   :  { %372 = dma.vmem_to_hbm [thread:$0]  %s370_s25, 128, %s829_s9, [#allocation4]  }
 0x2d1   :  { %580 = dma.done.wait [#allocation4], 128  }
 0x2d2   :  { %581 = vsyncadd [#allocation4], 4294967168 }
 0x2d3   :  { %376 = vsyncpa [#allocation3], 1 }
 0x2d4   :  { %377 = vsyncpa [#allocation6], 1 }
 0x2d5   :  { %378 = vsyncpa [#allocation4], 1 }

</bundles_post_ra>
